<compile_context>
chip_gen: v5e
topology: v5e:2x2
jax: 0.10.0
libtpu: 0.0.40
codegen_flags: <defaults>
</compile_context>

<pallas_src>
import jax
import jax.numpy as jnp
from jax.experimental import pallas as pl
from jax.experimental.pallas import tpu as pltpu


def addmm_kernel(inp_ref, x2_ref, x1_ref, o_ref, acc_ref):
    """One (tm, tn) output tile; grid axis 2 is the innermost K reduction."""
    k = pl.program_id(2)

    @pl.when(k == 0)
    def _init():
        # Initialize the f32 accumulator with the broadcast bias: the bias add
        # then costs nothing in the epilogue.
        acc_ref[...] = jnp.broadcast_to(
            x1_ref[...].astype(jnp.float32), acc_ref.shape
        )

    # MXU matmul with f32 accumulation (inputs may be bf16 on v6e/v7x).
    acc_ref[...] += jnp.dot(
        inp_ref[...], x2_ref[...], preferred_element_type=jnp.float32
    )

    @pl.when(k == pl.num_programs(2) - 1)
    def _finalize():
        o_ref[...] = acc_ref[...].astype(o_ref.dtype)


def _round_up(x, m):
    return ((x + m - 1) // m) * m


def _pick_tile_and_pad(dim, candidates, granule):
    """Pick (tile, padded_dim) for one dimension.

    The tile is either the full dim (dim < granule) or a multiple of
    `granule`; padded_dim is always a multiple of the tile, so the grid never
    truncates — edge handling is done by zero-padding in the wrapper.
    """
    if dim < granule:
        return dim, dim
    base = _round_up(dim, granule)
    # Prefer the largest candidate that divides the granule-rounded extent.
    for c in candidates:
        if c <= base and base % c == 0:
            return c, base
    # Otherwise accept a bigger tile if the extra padding is <= ~12.5%.
    for c in candidates:
        if c <= base:
            padded = _round_up(dim, c)
            if padded * 8 <= base * 9:
                return c, padded
    return granule, base


def _vmem_budget_bytes():
    """~75% of this generation's per-core VMEM (v5e/v6e: 128 MiB, v7x: 64 MiB)."""
    cap = None
    try:
        cap = getattr(pltpu.get_tpu_info(), "vmem_capacity_bytes", None)
    except Exception:
        cap = None
    if not cap:
        cap = 64 << 20  # conservative fallback: safe on every generation
    return int(cap) * 3 // 4


def _estimate_vmem(tm, tn, tk, in_itemsize, out_itemsize):
    return (
        2 * (tm * tk + tk * tn) * in_itemsize  # double-buffered A / B tiles
        + 2 * tn * 4                           # double-buffered f32 bias row
        + tm * tn * 4                          # resident f32 accumulator
        + 2 * tm * tn * out_itemsize           # double-buffered output tile
    )


def addmm(inp, x2, x1, *, use_bf16_inputs=False):
    """Computes inp @ x2 + x1 (x1 broadcast over rows), like torch.mm + add."""
    M, K = inp.shape
    K2, N = x2.shape
    assert K == K2, "inner dimensions must match"
    x1 = jnp.reshape(x1, (1, N))  # accept (N,) or (1, N) bias

    out_dtype = inp.dtype
    if use_bf16_inputs:
        # bf16 in / f32 accumulate: MXU-native on v6e/v7x (2x256^2 bf16) and
        # halves A/B HBM+VMEM traffic. Bias stays f32. Numerics differ from a
        # pure-f32 reference only by bf16 input rounding.
        inp = inp.astype(jnp.bfloat16)
        x2 = x2.astype(jnp.bfloat16)
    in_itemsize = jnp.dtype(inp.dtype).itemsize
    out_itemsize = jnp.dtype(out_dtype).itemsize

    # --- Tile selection: large tiles for A/B reuse, (8,128)-granular. ---
    tm, Mp = _pick_tile_and_pad(M, (512, 256, 128, 64, 32, 16, 8), 8)
    tn, Np = _pick_tile_and_pad(N, (512, 256, 128), 128)
    tk, Kp = _pick_tile_and_pad(K, (1024, 512, 256, 128), 128)

    # --- VMEM gating: shrink tiles until 2x the estimate fits the budget. ---
    budget = _vmem_budget_bytes()
    while 2 * _estimate_vmem(tm, tn, tk, in_itemsize, out_itemsize) > budget:
        if tk > 128:
            tk //= 2
        elif tn > 128:
            tn //= 2
        elif tm > 8:
            tm //= 2
        else:
            break

    # --- Megacore (v7x, 2 TCs): ensure a parallel axis has >= 2 blocks. ---
    if Mp // tm == 1 and Np // tn == 1:
        if tm >= 16 and Mp // (tm // 2) >= 2:
            tm //= 2
        elif tn >= 256 and Np // (tn // 2) >= 2:
            tn //= 2

    grid = (Mp // tm, Np // tn, Kp // tk)
    est = _estimate_vmem(tm, tn, tk, in_itemsize, out_itemsize)
    vmem_limit = int(min(max(2 * est, 4 << 20), budget))

    # --- Zero-pad to tile multiples (zeros don't change inp @ x2). ---
    if (Mp, Kp) != (M, K):
        inp = jnp.pad(inp, ((0, Mp - M), (0, Kp - K)))
    if (Kp, Np) != (K, N):
        x2 = jnp.pad(x2, ((0, Kp - K), (0, Np - N)))
    if Np != N:
        x1 = jnp.pad(x1, ((0, 0), (0, Np - N)))

    out = pl.pallas_call(
        addmm_kernel,
        out_shape=jax.ShapeDtypeStruct((Mp, Np), out_dtype),
        grid=grid,
        in_specs=[
            pl.BlockSpec((tm, tk), lambda i, j, k: (i, k)),
            pl.BlockSpec((tk, tn), lambda i, j, k: (k, j)),
            # Bias block index is k-invariant, so the pipeline does not
            # re-fetch it on every K step.
            pl.BlockSpec((1, tn), lambda i, j, k: (0, j)),
        ],
        out_specs=pl.BlockSpec((tm, tn), lambda i, j, k: (i, j)),
        scratch_shapes=[pltpu.VMEM((tm, tn), jnp.float32)],
        compiler_params=pltpu.CompilerParams(
            dimension_semantics=("parallel", "parallel", "arbitrary"),
            vmem_limit_bytes=vmem_limit,
        ),
    )(inp, x2, x1)

    if (Mp, Np) != (M, N):
        out = out[:M, :N]
    return out


if __name__ == "__main__":
    key = jax.random.PRNGKey(0)
    k_inp, k_x2, k_x1 = jax.random.split(key, 3)

    # Small, non-degenerate shapes consistent with the module's forward.
    M, K, N = 8, 32, 128
    inp = jax.random.normal(k_inp, (M, K), dtype=jnp.float32)
    x2 = jax.random.normal(k_x2, (K, N), dtype=jnp.float32)
    x1 = jax.random.normal(k_x1, (1, N), dtype=jnp.float32)  # broadcast bias

    ref = inp @ x2 + x1

    # 1) f32 path (faithful to the torch reference numerics).
    out = addmm(inp, x2, x1, use_bf16_inputs=False)
    jax.block_until_ready(out)
    assert out.shape == (M, N)
    assert jnp.allclose(out, ref, atol=1e-5, rtol=1e-5), "f32 mismatch"

    # 2) bf16 fast path (MXU-native on v6e/v7x), f32 accumulation, looser tol.
    out_bf16 = addmm(inp, x2, x1, use_bf16_inputs=True)
    jax.block_until_ready(out_bf16)
    assert jnp.allclose(out_bf16, ref, atol=1e-1, rtol=5e-2), "bf16 mismatch"

    # 3) non-divisible dims exercise the pad-and-slice edge handling.
    M2, K2, N2 = 12, 72, 200
    inp2 = jax.random.normal(k_inp, (M2, K2), dtype=jnp.float32)
    x2b = jax.random.normal(k_x2, (K2, N2), dtype=jnp.float32)
    x1b = jax.random.normal(k_x1, (1, N2), dtype=jnp.float32)
    out2 = addmm(inp2, x2b, x1b)
    jax.block_until_ready(out2)
    ref2 = inp2 @ x2b + x1b
    assert out2.shape == (M2, N2)
    assert jnp.allclose(out2, ref2, atol=1e-4, rtol=1e-4), "edge-case mismatch"

    print("KERNEL_OK")
</pallas_src>

<mosaic_0001>
module attributes {stable_mosaic.version = 11 : i64} {
  func.func @addmm_kernel(%arg0: i32, %arg1: i32, %arg2: i32, %arg3: memref<8x32xf32, #tpu.memory_space<vmem>>, %arg4: memref<32x128xf32, #tpu.memory_space<vmem>>, %arg5: memref<1x128xf32, #tpu.memory_space<vmem>>, %arg6: memref<8x128xf32, #tpu.memory_space<vmem>>, %arg7: memref<8x128xf32, #tpu.memory_space<vmem>>) attributes {dimension_semantics = [#tpu.dimension_semantics<parallel>, #tpu.dimension_semantics<parallel>, #tpu.dimension_semantics<arbitrary>], iteration_bounds = array<i64: 1, 1, 1>, scalar_prefetch = 0 : i64, scratch_operands = 1 : i64, tpu.core_type = #tpu.core_type<tc>, window_params = [{transform_indices = @transform_0, window_bounds = array<i64: 8, 32>}, {transform_indices = @transform_1, window_bounds = array<i64: 32, 128>}, {transform_indices = @transform_2, window_bounds = array<i64: 1, 128>}, {transform_indices = @transform_3, window_bounds = array<i64: 8, 128>}]} {
    %c0_i32 = arith.constant 0 : i32
    %0 = arith.cmpi eq, %arg2, %c0_i32 : i32
    %1 = arith.extui %0 : i1 to i32
    %c0_i32_0 = arith.constant 0 : i32
    %2 = arith.cmpi ne, %1, %c0_i32_0 : i32
    scf.if %2 {
      %c0_10 = arith.constant 0 : index
      %c0_11 = arith.constant 0 : index
      %12 = vector.load %arg5[%c0_10, %c0_11] : memref<1x128xf32, #tpu.memory_space<vmem>>, vector<1x128xf32>
      %13 = vector.shape_cast %12 : vector<1x128xf32> to vector<1x128xf32>
      %14 = vector.broadcast %13 : vector<1x128xf32> to vector<8x128xf32>
      %c0_12 = arith.constant 0 : index
      %c0_13 = arith.constant 0 : index
      %15 = vector.load %arg7[%c0_12, %c0_13] : memref<8x128xf32, #tpu.memory_space<vmem>>, vector<8x128xf32>
      tpu.vector_store %arg7[%c0_12, %c0_13], %14 {strides = array<i32>} : memref<8x128xf32, #tpu.memory_space<vmem>>, vector<8x128xf32>,
    } else {
    }
    %c0 = arith.constant 0 : index
    %c0_1 = arith.constant 0 : index
    %3 = vector.load %arg7[%c0, %c0_1] : memref<8x128xf32, #tpu.memory_space<vmem>>, vector<8x128xf32>
    %c0_2 = arith.constant 0 : index
    %c0_3 = arith.constant 0 : index
    %4 = vector.load %arg3[%c0_2, %c0_3] : memref<8x32xf32, #tpu.memory_space<vmem>>, vector<8x32xf32>
    %c0_4 = arith.constant 0 : index
    %c0_5 = arith.constant 0 : index
    %5 = vector.load %arg4[%c0_4, %c0_5] : memref<32x128xf32, #tpu.memory_space<vmem>>, vector<32x128xf32>
    %cst = arith.constant dense<0.000000e+00> : vector<8x128xf32>
    %6 = tpu.matmul %4, %5, %cst {dimension_numbers = #tpu.dot_dimension_numbers<[1], [0], [0], [1], [0, 0, 1, 1], [], []>} : vector<8x32xf32>, vector<32x128xf32>, vector<8x128xf32> -> vector<8x128xf32>
    %7 = arith.addf %3, %6 : vector<8x128xf32>
    %c0_6 = arith.constant 0 : index
    %c0_7 = arith.constant 0 : index
    %8 = vector.load %arg7[%c0_6, %c0_7] : memref<8x128xf32, #tpu.memory_space<vmem>>, vector<8x128xf32>
    tpu.vector_store %arg7[%c0_6, %c0_7], %7 {strides = array<i32>} : memref<8x128xf32, #tpu.memory_space<vmem>>, vector<8x128xf32>,
    %c0_i32_8 = arith.constant 0 : i32
    %9 = arith.cmpi eq, %arg2, %c0_i32_8 : i32
    %10 = arith.extui %9 : i1 to i32
    %c0_i32_9 = arith.constant 0 : i32
    %11 = arith.cmpi ne, %10, %c0_i32_9 : i32
    scf.if %11 {
      %c0_10 = arith.constant 0 : index
      %c0_11 = arith.constant 0 : index
      %12 = vector.load %arg7[%c0_10, %c0_11] : memref<8x128xf32, #tpu.memory_space<vmem>>, vector<8x128xf32>
      %c0_12 = arith.constant 0 : index
      %c0_13 = arith.constant 0 : index
      %13 = vector.load %arg6[%c0_12, %c0_13] : memref<8x128xf32, #tpu.memory_space<vmem>>, vector<8x128xf32>
      tpu.vector_store %arg6[%c0_12, %c0_13], %12 {strides = array<i32>} : memref<8x128xf32, #tpu.memory_space<vmem>>, vector<8x128xf32>,
    } else {
    }
    return
  }
  func.func @transform_0(%arg0: i32, %arg1: i32, %arg2: i32) -> (i32, i32) {
    %c0_i32 = arith.constant 0 : i32
    return %arg0, %arg2 : i32, i32
  }
  func.func @transform_1(%arg0: i32, %arg1: i32, %arg2: i32) -> (i32, i32) {
    %c0_i32 = arith.constant 0 : i32
    return %arg2, %arg1 : i32, i32
  }
  func.func @transform_2(%arg0: i32, %arg1: i32, %arg2: i32) -> (i32, i32) {
    %c0_i32 = arith.constant 0 : i32
    %c0_i32_0 = arith.constant 0 : i32
    return %c0_i32, %arg1 : i32, i32
  }
  func.func @transform_3(%arg0: i32, %arg1: i32, %arg2: i32) -> (i32, i32) {
    %c0_i32 = arith.constant 0 : i32
    return %arg0, %arg1 : i32, i32
  }
}

</mosaic_0001>

<bundles_post_ra>
// kernel: tpu_custom_call.1
= control target key start
LH: loop header
LB: loop body
LE: loop exit
PB: predicated region body
PF: predicated region fallthrough
CT: control target
= control target key end

     0   :  { %8 = vsyncpa [#allocation4], 0  ;;  %s231_s0 = inlined_call_operand.hbm [shape: f32[8,32], index: 0, kind: input, shape index: {}]   ;;  %s232_s1 = inlined_call_operand.hbm [shape: f32[32,128], index: 1, kind: input, shape index: {}]   ;;  %s233_s2 = inlined_call_operand.vmem [shape: f32[1,128], index: 2, kind: input, shape index: {}]   ;;  %s234_s3 = inlined_call_operand.hbm [shape: f32[8,128], index: 3, kind: output, shape index: {}]  }
   0x1   :  { %9 = vsyncpa [#allocation7], 0 }
   0x2   :  { %10 = vsyncpa [#allocation5], 0  ;;  %s16_s14 = sshll.u32 %s231_s0, 4  ;;  %s194_s15 = smov [#allocation3]   ;;  %s17_s14 = int_to_ptr.hbm [resolvable:$true] %s16_s14 }
   0x3   :  { %s18_s16 = sshll.u32 %s194_s15, 4  ;;  %s26_s19 = sshll.u32 %s232_s1, 4  ;;  %s19_s16 = int_to_ptr.vmem [resolvable:$true] %s18_s16  ;;  %s27_s19 = int_to_ptr.hbm [resolvable:$true] %s26_s19 }
   0x4   :  { %21 = dma.hbm_to_vmem [thread:$0]  %s17_s14, 128, %s19_s16, [#allocation4]  }
   0x5   :  { %s195_s20 = smov [#allocation6]   ;;  %s196_s22 = smov 128  }
   0x6   :  { %s28_s21 = sshll.u32 %s195_s20, 4  ;;  %s197_s23 = smov 8   ;;  %s29_s21 = int_to_ptr.vmem [resolvable:$true] %s28_s21 }
   0x7   :  { %34 = dma.hbm_to_vmem [thread:$0]  %s27_s19, 512, %s29_s21, [#allocation7], %s196_s22, %s196_s22, %s197_s23  }
   0x8   :  { %188 = dma.done.wait [#allocation4], 128  }
   0x9   :  { %189 = vsyncadd [#allocation4], 4294967168 }
   0xa   :  { %190 = dma.done.wait [#allocation7], 512  }
   0xb   :  { %191 = vsyncadd [#allocation7], 4294966784  ;;  %v59_v0 = vld [vmem:[#allocation6 + $0x18] sm:$0xff]  ;;  %v58_v1 = vld [vmem:[#allocation6 + $0x10] sm:$0xff]  ;;  %vm60_vm0 = vcmask 261120   ;;  %s198_s24 = smov [#allocation8]  }
   0xc   :  { %76 = vmatpush.msra.mxu0 %v59_v0  ;;  %v57_v2 = vld [vmem:[#allocation6 + $0x8] sm:$0xff]  ;;  %v56_v3 = vld [vmem:[#allocation6] sm:$0xff]  ;;  %v55_v4 = vld [vmem:[#allocation3] sm:$0xff]  ;;  %s96_s25 = sshll.u32 %s198_s24, 4  ;;  %s98_s28 = sshll.u32 %s234_s3, 4  ;;  %s97_s25 = int_to_ptr.vmem [resolvable:$true] %s96_s25  ;;  %s99_s28 = int_to_ptr.hbm [resolvable:$true] %s98_s28 }
   0xd   :  { %v115_v5 = vld [vmem:[%s233_s2] ss:$0 sm:$0xff] }
   0xe   :  { %77 = vmatpush.msra.mxu0 %v58_v1 }
  0x10   :  { %78 = vmatpush.msra.mxu0 %v57_v2 }
  0x12   :  { %79 = vmatpush.msra.mxu0 %v56_v3 }
  0x13   :  { %109 = vmatmul.msk.f32.vlgmr.msra.gmra.mxu0 %vm60_vm0, %v55_v4 }
  0x90   :  { %v81_v6 = vpop.f32.mrf.mxu0 }
  0x91   :  { %v84_v7 = vadd.f32 %v115_v5, %v81_v6 }
  0x93   :  { %90 = vst [vmem:[#allocation8] sm:$0xff] %v84_v7 }
  0x94   :  { %101 = dma.vmem_to_hbm [thread:$0]  %s97_s25, 128, %s99_s28, [#allocation5]  }
  0x95   :  { %192 = dma.done.wait [#allocation5], 128  }
  0x96   :  { %193 = vsyncadd [#allocation5], 4294967168 }
  0x97   :  { %106 = vsyncpa [#allocation4], 1 }
  0x98   :  { %107 = vsyncpa [#allocation7], 1 }
  0x99   :  { %108 = vsyncpa [#allocation5], 1 }

</bundles_post_ra>
